<compile_context>
chip_gen: v5e
topology: v5e:2x2
jax: 0.10.0
libtpu: 0.0.40
codegen_flags: <defaults>
</compile_context>

<pallas_src>
import jax
import jax.numpy as jnp
from jax.experimental import pallas as pl
from jax.experimental.pallas import tpu as pltpu


_MIB = 1024 * 1024


def _pointwise_conv_kernel(x_ref, w_ref, b_ref, o_ref):
    # x_ref: (Nb, C_in, TILE_M)   spatial pixels on the lane axis
    # w_ref: (C_out, C_in)        resident across the whole grid
    # b_ref: (C_out, 1)           lane-broadcast bias
    # o_ref: (Nb, C_out, TILE_M)
    w = w_ref[...]
    b = b_ref[...].astype(jnp.float32)
    for i in range(x_ref.shape[0]):  # static unroll over the batch sub-block
        acc = jnp.dot(w, x_ref[i], preferred_element_type=jnp.float32) + b
        o_ref[i] = acc.astype(o_ref.dtype)


def _round_up(x, m):
    return ((x + m - 1) // m) * m


def _round_down(x, m):
    return (x // m) * m


def _largest_divisor_leq(n, cap):
    cap = max(1, min(n, cap))
    for d in range(cap, 0, -1):
        if n % d == 0:
            return d
    return 1


def _vmem_caps():
    """(physical_vmem_bytes, tile_budget_bytes) for the current generation."""
    try:
        cap = int(pltpu.get_tpu_info().vmem_capacity_bytes)
    except Exception:  # conservative fallback: assume v7x-sized VMEM
        cap = 64 * _MIB
    if cap <= 64 * _MIB:      # v7x: 64 MiB physical -> stay well clear
        return cap, 44 * _MIB
    return cap, 96 * _MIB     # v5e / v6e: 128 MiB physical


def _select_tiling(N, C_in, C_out, HW, act_itemsize, w_itemsize):
    """Pick (Nb, tile_m, vmem_limit_bytes) from a VMEM byte budget."""
    physical, budget = _vmem_caps()

    weight_bytes = C_out * C_in * w_itemsize          # single-buffered
    bias_bytes = C_out * w_itemsize
    headroom = 2 * _MIB
    per_lane = 2 * (C_in + C_out) * act_itemsize      # double-buffered in + out
    avail = budget - weight_bytes - bias_bytes - headroom
    max_lanes = max(128, avail // per_lane)

    if HW <= max_lanes:
        # Whole spatial extent fits: block batch elements per grid step so
        # each step is one large contiguous DMA.
        tile_m = HW
        nb_cap = min(max(1, max_lanes // HW), 32, N)  # 32 bounds the in-kernel unroll
        nb = _largest_divisor_leq(N, nb_cap)
        if nb == N and N >= 2:
            # keep >= 2 grid steps so both v7x TensorCores get work
            nb = _largest_divisor_leq(N, max(1, N // 2))
        if N == 1 and HW >= 256:
            # single batch element: split spatially instead for >= 2 steps
            nb = 1
            tile_m = max(128, min(_round_down(max_lanes, 128),
                                  _round_up(pl.cdiv(HW, 2), 128)))
    else:
        nb = 1
        max_tile = max(128, _round_down(max_lanes, 128))
        nblk = pl.cdiv(HW, max_tile)
        # balanced 128-aligned tiles: last tile is full or a 128 multiple
        tile_m = min(max_tile, max(128, _round_up(pl.cdiv(HW, nblk), 128)))

    footprint = (weight_bytes + bias_bytes
                 + 2 * nb * tile_m * (C_in + C_out) * act_itemsize)
    vmem_limit = min(max(budget, footprint + 4 * _MIB), physical)
    return nb, tile_m, int(vmem_limit)


@jax.jit
def pointwise_convolution(x_nchw, weight, bias):
    """1x1 conv (pointwise) matching nn.Conv2d(in_channels, out_channels, 1).

    x_nchw : (N, C_in, H, W)
    weight : (C_out, C_in)   -- torch weight (C_out, C_in, 1, 1) squeezed
    bias   : (C_out,)
    returns: (N, C_out, H, W)
    """
    N, C_in, H, W = x_nchw.shape
    C_out = weight.shape[0]
    HW = H * W

    # Free reshapes (no data movement): NCHW is already (N, C_in, HW)-major.
    x = x_nchw.reshape(N, C_in, HW)
    b_col = bias.reshape(C_out, 1)

    nb, tile_m, vmem_limit = _select_tiling(
        N, C_in, C_out, HW, x.dtype.itemsize, weight.dtype.itemsize)
    grid = (N // nb, pl.cdiv(HW, tile_m))

    flops = 2 * N * HW * C_in * C_out
    bytes_accessed = (
        x.size * x.dtype.itemsize
        + weight.size * weight.dtype.itemsize
        + bias.size * bias.dtype.itemsize
        + N * C_out * HW * x.dtype.itemsize
    )

    out = pl.pallas_call(
        _pointwise_conv_kernel,
        out_shape=jax.ShapeDtypeStruct((N, C_out, HW), x_nchw.dtype),
        grid=grid,
        in_specs=[
            # activations: (Nb, C_in, tile_m) — channels on sublanes,
            # pixels on lanes; double-buffered by default.
            pl.BlockSpec((nb, C_in, tile_m), lambda n, m: (n, 0, m)),
            # weight / bias: resident across the grid -> single-buffered.
            pl.BlockSpec((C_out, C_in), lambda n, m: (0, 0),
                         pipeline_mode=pl.Buffered(1)),
            pl.BlockSpec((C_out, 1), lambda n, m: (0, 0),
                         pipeline_mode=pl.Buffered(1)),
        ],
        out_specs=pl.BlockSpec((nb, C_out, tile_m), lambda n, m: (n, 0, m)),
        compiler_params=pltpu.CompilerParams(
            dimension_semantics=("parallel", "parallel"),
            vmem_limit_bytes=vmem_limit,
        ),
        cost_estimate=pl.CostEstimate(
            flops=flops, transcendentals=0, bytes_accessed=bytes_accessed
        ),
    )(x, weight, b_col)

    # Free reshape back to NCHW.
    return out.reshape(N, C_out, H, W)


if __name__ == "__main__":
    key = jax.random.PRNGKey(0)
    k_x, k_w, k_b = jax.random.split(key, 3)

    N, C_in, C_out, Hs, Ws = 2, 4, 8, 16, 16

    x = jax.random.normal(k_x, (N, C_in, Hs, Ws), dtype=jnp.float32)
    # Deterministic synthetic params (shapes follow nn.Conv2d(C_in, C_out, 1)).
    bound = 1.0 / (C_in ** 0.5)
    weight = jax.random.uniform(k_w, (C_out, C_in), dtype=jnp.float32,
                                minval=-bound, maxval=bound)
    bias = jax.random.uniform(k_b, (C_out,), dtype=jnp.float32,
                              minval=-bound, maxval=bound)

    out = pointwise_convolution(x, weight, bias)
    out = jax.block_until_ready(out)

    # Reference check against plain-JAX einsum (same math as torch 1x1 conv).
    ref = jnp.einsum("nchw,oc->nohw", x, weight) + bias[None, :, None, None]
    assert out.shape == (N, C_out, Hs, Ws)
    assert jnp.allclose(out, ref, atol=1e-5, rtol=1e-5)

    print("KERNEL_OK")
</pallas_src>

<mosaic_0001>
module attributes {stable_mosaic.version = 11 : i64} {
  func.func @_pointwise_conv_kernel(%arg0: i32, %arg1: i32, %arg2: memref<1x4x256xf32, #tpu.memory_space<vmem>>, %arg3: memref<8x4xf32, #tpu.memory_space<vmem>>, %arg4: memref<8x1xf32, #tpu.memory_space<vmem>>, %arg5: memref<1x8x256xf32, #tpu.memory_space<vmem>>) attributes {dimension_semantics = [#tpu.dimension_semantics<parallel>, #tpu.dimension_semantics<parallel>], iteration_bounds = array<i64: 2, 1>, scalar_prefetch = 0 : i64, scratch_operands = 0 : i64, tpu.core_type = #tpu.core_type<tc>, window_params = [{transform_indices = @transform_0, window_bounds = array<i64: 1, 4, 256>}, {pipeline_mode = #tpu.pipeline_mode<synchronous>, transform_indices = @transform_1, window_bounds = array<i64: 8, 4>}, {pipeline_mode = #tpu.pipeline_mode<synchronous>, transform_indices = @transform_2, window_bounds = array<i64: 8, 1>}, {transform_indices = @transform_3, window_bounds = array<i64: 1, 8, 256>}]} {
    %c0 = arith.constant 0 : index
    %c0_0 = arith.constant 0 : index
    %0 = vector.load %arg3[%c0, %c0_0] : memref<8x4xf32, #tpu.memory_space<vmem>>, vector<8x4xf32>
    %c0_1 = arith.constant 0 : index
    %c0_2 = arith.constant 0 : index
    %1 = vector.load %arg4[%c0_1, %c0_2] : memref<8x1xf32, #tpu.memory_space<vmem>>, vector<8x1xf32>
    %c0_3 = arith.constant 0 : index
    %c0_4 = arith.constant 0 : index
    %c0_5 = arith.constant 0 : index
    %2 = vector.load %arg2[%c0_3, %c0_4, %c0_5] : memref<1x4x256xf32, #tpu.memory_space<vmem>>, vector<1x4x256xf32>
    %3 = vector.shape_cast %2 : vector<1x4x256xf32> to vector<4x256xf32>
    %cst = arith.constant dense<0.000000e+00> : vector<8x256xf32>
    %4 = tpu.matmul %0, %3, %cst {dimension_numbers = #tpu.dot_dimension_numbers<[1], [0], [0], [1], [0, 0, 1, 1], [], []>} : vector<8x4xf32>, vector<4x256xf32>, vector<8x256xf32> -> vector<8x256xf32>
    %5 = vector.broadcast %1 : vector<8x1xf32> to vector<8x256xf32>
    %6 = arith.addf %4, %5 : vector<8x256xf32>
    %c0_6 = arith.constant 0 : index
    %c0_7 = arith.constant 0 : index
    %c0_8 = arith.constant 0 : index
    %7 = vector.load %arg5[%c0_6, %c0_7, %c0_8] : memref<1x8x256xf32, #tpu.memory_space<vmem>>, vector<1x8x256xf32>
    %8 = vector.shape_cast %7 : vector<1x8x256xf32> to vector<8x256xf32>
    %9 = vector.shape_cast %6 : vector<8x256xf32> to vector<1x8x256xf32>
    tpu.vector_store %arg5[%c0_6, %c0_7, %c0_8], %9 {strides = array<i32>} : memref<1x8x256xf32, #tpu.memory_space<vmem>>, vector<1x8x256xf32>,
    return
  }
  func.func @transform_0(%arg0: i32, %arg1: i32) -> (i32, i32, i32) {
    %c0_i32 = arith.constant 0 : i32
    %c0_i32_0 = arith.constant 0 : i32
    return %arg0, %c0_i32, %arg1 : i32, i32, i32
  }
  func.func @transform_1(%arg0: i32, %arg1: i32) -> (i32, i32) {
    %c0_i32 = arith.constant 0 : i32
    %c0_i32_0 = arith.constant 0 : i32
    %c0_i32_1 = arith.constant 0 : i32
    return %c0_i32, %c0_i32_0 : i32, i32
  }
  func.func @transform_2(%arg0: i32, %arg1: i32) -> (i32, i32) {
    %c0_i32 = arith.constant 0 : i32
    %c0_i32_0 = arith.constant 0 : i32
    %c0_i32_1 = arith.constant 0 : i32
    return %c0_i32, %c0_i32_0 : i32, i32
  }
  func.func @transform_3(%arg0: i32, %arg1: i32) -> (i32, i32, i32) {
    %c0_i32 = arith.constant 0 : i32
    %c0_i32_0 = arith.constant 0 : i32
    return %arg0, %c0_i32, %arg1 : i32, i32, i32
  }
}

</mosaic_0001>

<bundles_post_ra>
// kernel: pointwise_convolution.1
= control target key start
LH: loop header
LB: loop body
LE: loop exit
PB: predicated region body
PF: predicated region fallthrough
CT: control target
= control target key end

     0   :  { %s448_s12 = smov 0   ;;  %s450_s13 = smov 0   ;;  %s487_s0 = inlined_call_operand.vmem [shape: f32[2,4,256], index: 0, kind: input, shape index: {}]   ;;  %s488_s1 = inlined_call_operand.vmem [shape: f32[8,4], index: 1, kind: input, shape index: {}]   ;;  %s489_s2 = inlined_call_operand.vmem [shape: f32[8,1], index: 2, kind: input, shape index: {}]   ;;  %s490_s3 = inlined_call_operand.vmem [shape: f32[2,8,256], index: 3, kind: output, shape index: {}]  }
   0x1   :  { %s452_s14 = smov 0  }
   0x2 LB: > { %s25_s15 = sadd.s32 1, %s421_s13  ;;  %p364_p0 = scmp.ge.s32.totalorder %s425_s14, 1  ;;  %s425_s14 = sphi %s452_s14, %s13_s14   ;;  %s421_s13 = sphi %s450_s13, %s492_s13   ;;  %s417_s12 = sphi %s448_s12, %s491_s12  }
   0x3   : > { %p27_p1 = scmp.ge.s32.totalorder %s25_s15, 2  ;;  %p158_p2 = scmp.lt.s32.totalorder %s425_s14, 3 }
   0x5   : > { %s494_s15 = smov (%p27_p1, %s25_s15), 0  ;;  %p159_p3 = pnand %p364_p0, %p158_p2 }
   0x6   : > { %p191_p4 = scmp.lt.s32.totalorder (!%p159_p3), %s417_s12, 1 }
   0x7   : > { %162 = sbr.rel (%p159_p3) target bundleno = 155 (0x9b), region = 32 }
   0xc   : > { %v211_v0 = vld [vmem:[%s489_s2] sm:$0xff]  ;;  %v427_v1 = vmov 0   ;;  %s496_s12 = smov (!%p191_p4, %s417_s12), 1  ;;  %vm226_vm0 = vcmask 1043456   ;;  %vm222_vm1 = vcmask 31744  }
   0xd   : > { %402 = vset.pattern.permute.xlu0 %v427_v1  ;;  %s375_s18 = sshll.u32 %s496_s12, 3  ;;  %v210_v3 = vld [vmem:[%s488_s1] sm:$0xff]  ;;  %s376_s24 = sshll.u32 %s496_s12, 4 }
   0xe   : > { %215 = vperm.xlu0 %402, %v211_v0   ;;  %s198_s21 = scalar_lea.vmem %s487_s0, %s375_s18  ;;  %s208_s27 = scalar_lea.vmem %s490_s3, %s376_s24 }
   0xf   : > { %v212_v2 = vld [vmem:[%s198_s21] sm:$0xff] }
  0x10   : > { %219 = vst [vmem:[#allocation1] ss:$2 sm:$0xff] %v212_v2 }
  0x17   : > { %v220_v4 = vld.sshfl [vmem:[#allocation1] sm:$0xff pattern:$0x75316420]  ;;  %v221_v5 = vld.sshfl [vmem:[#allocation1 + $0x8] sm:$0xff pattern:$0x75316420] }
  0x18   : > { %369 = vmatpush.msk.msra.mxu0 %vm226_vm0, %v220_v4  ;;  %371 = vmatpush.msk.msra.mxu1 %vm226_vm0, %v221_v5 }
  0x19   : > { %370 = vmatmul.msk.f32.vlgmr.msra.gmra.mxu0 %vm222_vm1, %v210_v3  ;;  %372 = vmatmul.msk.f32.vlgmr.msra.gmra.mxu1 %vm222_vm1, %v210_v3 }
  0x80   : > { %v216_v6 = vpop.permute.xlu0 %215 }
  0x96   : > { %v248_v7 = vpop.f32.mrf.mxu0  ;;  %v268_v8 = vpop.f32.mrf.mxu1 }
  0x97   : > { %v249_v9 = vadd.f32 %v248_v7, %v216_v6  ;;  %v269_v10 = vadd.f32 %v268_v8, %v216_v6 }
  0x99   : > { %271 = vst [vmem:[%s208_s27] sm:$0xff] %v249_v9 }
  0x9a   : > { %272 = vst [vmem:[%s208_s27 + $0x8] sm:$0xff] %v269_v10 }
  0x9b PF: > { %s13_s14 = sadd.s32 1, %s425_s14   ;;  %s491_s12 = smov %s421_s13 }
  0x9c   : > { %p10_p5 = scmp.ge.s32.totalorder %s13_s14, 4   ;;  %s492_s13 = smov %s494_s15 }
  0x9e   :  { %12 = sbr.rel (!%p10_p5) target bundleno = 2 (0x2), region = 62 }

</bundles_post_ra>
